<compile_context>
chip_gen: v7x
topology: tpu7x:2x2x1
jax: 0.10.0
libtpu: 0.0.40
codegen_flags: <defaults>
</compile_context>

<pallas_src>
import functools

import jax
import jax.numpy as jnp
from jax import lax
from jax.experimental import pallas as pl
from jax.experimental.pallas import tpu as pltpu


def _round_up(x, m):
    return ((x + m - 1) // m) * m


def _scalar_loss_kernel(pred_ref, gt_ref, acc_ref, *, tau, order, tb, tt,
                        n_rows, n_cols, tiles_per_split, mask_rows, col_thresh):
    """One (TB, TT) tile: clipped loss, partial-summed into acc_ref.

    pred_ref: [TB, TT] native dtype (VMEM)
    gt_ref:   [TB, 1]  native dtype (VMEM), resident per batch tile
    acc_ref:  [8, TT]  f32 output block; accumulator across the time axis
    """
    ci = pl.program_id(0)                 # core-split index (time groups)
    bi = pl.program_id(1)                 # batch-tile index
    ti = pl.program_id(2)                 # local time-tile index within split
    gti = ci * tiles_per_split + ti       # global time-tile index

    # Output block is resident across the whole (local) time axis for this
    # (split, batch-tile); zero it on the first local time step only.
    @pl.when(ti == 0)
    def _():
        acc_ref[...] = jnp.zeros_like(acc_ref)

    def accumulate(do_mask_rows, do_mask_cols):
        pred = pred_ref[...].astype(jnp.float32)       # [TB, TT]
        gt = gt_ref[...].astype(jnp.float32)           # [TB, 1] lane-broadcast
        diff = pred - gt

        if order == 2:
            val = diff * diff                          # MSELoss(reduction='none')
            if tau >= 0.0:
                keep = val > (tau * tau)               # |diff| > tau, no abs
            else:
                keep = jnp.abs(diff) > tau
        elif order == 1:
            val = jnp.abs(diff)                        # L1Loss(reduction='none')
            keep = val > tau
        else:
            raise NotImplementedError

        # Only emitted on tiles that may contain out-of-bounds garbage.
        if do_mask_rows:
            rows = bi * tb + lax.broadcasted_iota(jnp.int32, (tb, tt), 0)
            keep = jnp.logical_and(keep, rows < n_rows)
        if do_mask_cols:
            cols = gti * tt + lax.broadcasted_iota(jnp.int32, (tb, tt), 1)
            keep = jnp.logical_and(keep, cols < n_cols)

        # Select (not multiply) so NaN/Inf garbage from OOB reads cannot leak.
        contrib = jnp.where(keep, val, 0.0)

        # Regroup onto the native (8, lane) tiling and reduce the leading dim
        # with elementwise VPU adds; the single expensive cross-lane reduction
        # happens once, outside the kernel, on a tiny array.
        acc_ref[...] += jnp.sum(contrib.reshape(tb // 8, 8, tt), axis=0)

    if not mask_rows and col_thresh is None:
        # Shapes are tile-aligned and the split is exact: always fast path.
        accumulate(False, False)
    else:
        needs = None
        if mask_rows:
            needs = bi == pl.num_programs(1) - 1
        if col_thresh is not None:
            c = gti >= col_thresh
            needs = c if needs is None else jnp.logical_or(needs, c)

        @pl.when(needs)
        def _():
            accumulate(mask_rows, col_thresh is not None)

        @pl.when(jnp.logical_not(needs))
        def _():
            accumulate(False, False)


def scalar_loss(pred_score, gt_score, *, tau, order=2, masked_loss=False,
                lens=None, block_b=256, block_t=4096):
    """Pallas equivalent of ScalarLoss.forward.

    pred_score: [batch, time, 1]  (any float dtype; bf16 OK, upcast in-kernel)
    gt_score:   [batch]           (float)
    returns scalar float32 loss.
    """
    if masked_loss:
        # TODO(synk): masked_loss path (make_non_pad_mask + masked_select) has
        # data-dependent ragged shapes; not implemented in this kernel.
        raise NotImplementedError("masked_loss=True not supported in this kernel")
    if order not in (1, 2):
        raise NotImplementedError

    b, t = int(pred_score.shape[0]), int(pred_score.shape[1])

    # Glue: squeeze(-1); keep native dtype in HBM (upcast happens in-kernel).
    pred2d = pred_score.reshape(b, t)
    gt2d = gt_score.reshape(b, 1)

    # Lane/sublane-aligned tiles, clamped so tiny inputs become one tile.
    tb = _round_up(min(int(block_b), _round_up(b, 8)), 8)
    tt = _round_up(min(int(block_t), _round_up(t, 128)), 128)

    n_btiles = (b + tb - 1) // tb
    n_ttiles = (t + tt - 1) // tt

    # When there is a single batch tile, split the time tiles into two groups
    # on a leading "parallel" axis so v7x's second TensorCore gets work.
    n_split = 2 if (n_btiles == 1 and n_ttiles >= 2) else 1
    tps = (n_ttiles + n_split - 1) // n_split      # time tiles per split

    mask_rows = (b % tb) != 0
    col_tail = (t % tt) != 0
    overflow = (n_split * tps) != n_ttiles         # uneven split -> dummy tiles
    if col_tail:
        col_thresh = n_ttiles - 1                  # last real tile is partial
    elif overflow:
        col_thresh = n_ttiles                      # only dummy tiles need masking
    else:
        col_thresh = None

    kernel = functools.partial(
        _scalar_loss_kernel, tau=float(tau), order=int(order), tb=tb, tt=tt,
        n_rows=b, n_cols=t, tiles_per_split=tps, mask_rows=mask_rows,
        col_thresh=col_thresh)

    def pred_map(ci, bi, ti):
        # Clamp so dummy (fully out-of-range) tiles of an uneven split re-read
        # the last valid tile; the kernel masks their contribution to zero.
        return (bi, jnp.minimum(ci * tps + ti, n_ttiles - 1))

    # Raise the scoped-VMEM limit only when the requested tiles need it
    # (default 256x4096 f32 stays under every generation's default limit).
    vmem_est = (2 * tb * tt * pred2d.dtype.itemsize
                + 2 * tb * gt2d.dtype.itemsize
                + 2 * 8 * tt * 4 + (1 << 20))
    vmem_limit = None
    if vmem_est > (12 << 20):
        vmem_limit = min(int(vmem_est) * 3 // 2, 48 << 20)

    out_bytes = n_split * n_btiles * 8 * tt * 4
    cost = pl.CostEstimate(
        flops=6 * b * t,
        transcendentals=0,
        bytes_accessed=b * t * pred2d.dtype.itemsize
        + b * gt2d.dtype.itemsize + out_bytes)

    partials = pl.pallas_call(
        kernel,
        out_shape=jax.ShapeDtypeStruct((n_split, n_btiles, 8, tt), jnp.float32),
        grid=(n_split, n_btiles, tps),
        in_specs=[
            pl.BlockSpec((tb, tt), pred_map),
            pl.BlockSpec((tb, 1), lambda ci, bi, ti: (bi, 0)),   # resident per b-tile
        ],
        out_specs=pl.BlockSpec((None, None, 8, tt),
                               lambda ci, bi, ti: (ci, bi, 0, 0)),
        compiler_params=pltpu.CompilerParams(
            dimension_semantics=("parallel", "parallel", "arbitrary"),
            vmem_limit_bytes=vmem_limit),
        cost_estimate=cost,
    )(pred2d, gt2d)

    # Single tiny cross-lane reduction + normalization by the true count.
    # (f32 accumulation; for B*T >~ 1e8 consider a two-stage final reduction.)
    return jnp.sum(partials) / jnp.float32(b * t)


def _reference_loss(pred_score, gt_score, tau, order=2):
    """Pure-JAX reference mirroring the PyTorch module."""
    y_hat = jnp.squeeze(pred_score, axis=-1).astype(jnp.float32)   # [B, T]
    t = y_hat.shape[1]
    label = jnp.repeat(gt_score.astype(jnp.float32)[:, None], t, axis=1)
    diff = y_hat - label
    per_elem = diff * diff if order == 2 else jnp.abs(diff)
    thresh = (jnp.abs(diff) > tau).astype(per_elem.dtype)
    return jnp.mean(thresh * per_elem)


if __name__ == "__main__":
    key = jax.random.PRNGKey(0)
    k1, k2 = jax.random.split(key)

    tau = 0.5

    # Base case: tiny shape, single tile, masked path.
    batch, time = 2, 8
    pred_score = jax.random.normal(k1, (batch, time, 1), dtype=jnp.float32)
    gt_score = jax.random.normal(k2, (batch,), dtype=jnp.float32)

    loss = jax.block_until_ready(scalar_loss(pred_score, gt_score, tau=tau, order=2))
    ref = _reference_loss(pred_score, gt_score, tau, order=2)
    assert jnp.allclose(loss, ref, atol=1e-6, rtol=1e-6), (loss, ref)

    # L1 (order=1) path.
    loss1 = jax.block_until_ready(
        scalar_loss(pred_score, gt_score, tau=tau, order=1))
    ref1 = _reference_loss(pred_score, gt_score, tau, order=1)
    assert jnp.allclose(loss1, ref1, atol=1e-6, rtol=1e-6), (loss1, ref1)

    # Single batch tile + even dual-core time split + row/col tails.
    b2, t2 = 2, 1000
    p2 = jax.random.normal(k1, (b2, t2, 1), dtype=jnp.float32)
    g2 = jax.random.normal(k2, (b2,), dtype=jnp.float32)
    loss2 = jax.block_until_ready(
        scalar_loss(p2, g2, tau=tau, order=2, block_b=8, block_t=128))
    ref2 = _reference_loss(p2, g2, tau, order=2)
    assert jnp.allclose(loss2, ref2, atol=1e-5, rtol=1e-5), (loss2, ref2)

    # Uneven (odd tile count) time split -> exercises dummy overflow tiles.
    b3, t3 = 5, 600
    p3 = jax.random.normal(k1, (b3, t3, 1), dtype=jnp.float32)
    g3 = jax.random.normal(k2, (b3,), dtype=jnp.float32)
    loss3 = jax.block_until_ready(
        scalar_loss(p3, g3, tau=tau, order=2, block_b=8, block_t=128))
    ref3 = _reference_loss(p3, g3, tau, order=2)
    assert jnp.allclose(loss3, ref3, atol=1e-5, rtol=1e-5), (loss3, ref3)

    # Multiple batch tiles, no split: interior fast path + col-tail masked path.
    b4, t4 = 24, 300
    p4 = jax.random.normal(k1, (b4, t4, 1), dtype=jnp.float32)
    g4 = jax.random.normal(k2, (b4,), dtype=jnp.float32)
    loss4 = jax.block_until_ready(
        scalar_loss(p4, g4, tau=tau, order=2, block_b=8, block_t=128))
    ref4 = _reference_loss(p4, g4, tau, order=2)
    assert jnp.allclose(loss4, ref4, atol=1e-5, rtol=1e-5), (loss4, ref4)

    print("KERNEL_OK")
</pallas_src>

<mosaic_0001>
module attributes {stable_mosaic.version = 11 : i64} {
  func.func @_scalar_loss_kernel(%arg0: i32, %arg1: i32, %arg2: i32, %arg3: memref<8x128xf32, #tpu.memory_space<vmem>>, %arg4: memref<8x1xf32, #tpu.memory_space<vmem>>, %arg5: memref<1x1x8x128xf32, #tpu.memory_space<vmem>>) attributes {dimension_semantics = [#tpu.dimension_semantics<parallel>, #tpu.dimension_semantics<parallel>, #tpu.dimension_semantics<arbitrary>], iteration_bounds = array<i64: 1, 1, 1>, scalar_prefetch = 0 : i64, scratch_operands = 0 : i64, tpu.core_type = #tpu.core_type<tc>, window_params = [{transform_indices = @transform_0, window_bounds = array<i64: 8, 128>}, {transform_indices = @transform_1, window_bounds = array<i64: 8, 1>}, {transform_indices = @transform_2, window_bounds = array<i64: 1, 1, 8, 128>}]} {
    %c1_i32 = arith.constant 1 : i32
    %0 = arith.muli %arg0, %c1_i32 : i32
    %1 = arith.addi %0, %arg2 : i32
    %c0_i32 = arith.constant 0 : i32
    %2 = arith.cmpi eq, %arg2, %c0_i32 : i32
    %3 = arith.extui %2 : i1 to i32
    %c0_i32_0 = arith.constant 0 : i32
    %4 = arith.cmpi ne, %3, %c0_i32_0 : i32
    scf.if %4 {
      %cst = arith.constant 0.000000e+00 : f32
      %13 = vector.broadcast %cst : f32 to vector<8x128xf32>
      %c0 = arith.constant 0 : index
      %c0_5 = arith.constant 0 : index
      %c0_6 = arith.constant 0 : index
      %c0_7 = arith.constant 0 : index
      %14 = vector.load %arg5[%c0, %c0_5, %c0_6, %c0_7] : memref<1x1x8x128xf32, #tpu.memory_space<vmem>>, vector<1x1x8x128xf32>
      %15 = vector.shape_cast %14 : vector<1x1x8x128xf32> to vector<8x128xf32>
      %16 = vector.shape_cast %13 : vector<8x128xf32> to vector<1x1x8x128xf32>
      tpu.vector_store %arg5[%c0, %c0_5, %c0_6, %c0_7], %16 {strides = array<i32>} : memref<1x1x8x128xf32, #tpu.memory_space<vmem>>, vector<1x1x8x128xf32>,
    } else {
    }
    %c0_i32_1 = arith.constant 0 : i32
    %5 = arith.cmpi eq, %arg1, %c0_i32_1 : i32
    %c0_i32_2 = arith.constant 0 : i32
    %6 = arith.cmpi sge, %1, %c0_i32_2 : i32
    %7 = arith.ori %5, %6 : i1
    %8 = arith.extui %7 : i1 to i32
    %c0_i32_3 = arith.constant 0 : i32
    %9 = arith.cmpi ne, %8, %c0_i32_3 : i32
    scf.if %9 {
      %c0 = arith.constant 0 : index
      %c0_5 = arith.constant 0 : index
      %13 = vector.load %arg3[%c0, %c0_5] : memref<8x128xf32, #tpu.memory_space<vmem>>, vector<8x128xf32>
      %c0_6 = arith.constant 0 : index
      %c0_7 = arith.constant 0 : index
      %14 = vector.load %arg4[%c0_6, %c0_7] : memref<8x1xf32, #tpu.memory_space<vmem>>, vector<8x1xf32>
      %15 = vector.broadcast %14 : vector<8x1xf32> to vector<8x128xf32>
      %16 = arith.subf %13, %15 : vector<8x128xf32>
      %17 = arith.mulf %16, %16 : vector<8x128xf32>
      %cst = arith.constant 2.500000e-01 : f32
      %18 = vector.broadcast %cst : f32 to vector<8x128xf32>
      %19 = arith.cmpf ogt, %17, %18 : vector<8x128xf32>
      %c8_i32 = arith.constant 8 : i32
      %20 = arith.muli %arg1, %c8_i32 : i32
      %21 = tpu.iota {dimensions = array<i32: 0>} : vector<8x128xi32>
      %22 = vector.broadcast %20 : i32 to vector<8x128xi32>
      %23 = arith.addi %22, %21 : vector<8x128xi32>
      %c2_i32 = arith.constant 2 : i32
      %24 = vector.broadcast %c2_i32 : i32 to vector<8x128xi32>
      %25 = arith.cmpi slt, %23, %24 : vector<8x128xi32>
      %26 = arith.andi %19, %25 : vector<8x128xi1>
      %c128_i32 = arith.constant 128 : i32
      %27 = arith.muli %1, %c128_i32 : i32
      %28 = tpu.iota {dimensions = array<i32: 1>} : vector<8x128xi32>
      %29 = vector.broadcast %27 : i32 to vector<8x128xi32>
      %30 = arith.addi %29, %28 : vector<8x128xi32>
      %c8_i32_8 = arith.constant 8 : i32
      %31 = vector.broadcast %c8_i32_8 : i32 to vector<8x128xi32>
      %32 = arith.cmpi slt, %30, %31 : vector<8x128xi32>
      %33 = arith.andi %26, %32 : vector<8x128xi1>
      %cst_9 = arith.constant 0.000000e+00 : f32
      %34 = vector.broadcast %cst_9 : f32 to vector<8x128xf32>
      %35 = arith.select %33, %17, %34 : vector<8x128xi1>, vector<8x128xf32>
      %c0_10 = arith.constant 0 : index
      %c0_11 = arith.constant 0 : index
      %c0_12 = arith.constant 0 : index
      %c0_13 = arith.constant 0 : index
      %36 = vector.load %arg5[%c0_10, %c0_11, %c0_12, %c0_13] : memref<1x1x8x128xf32, #tpu.memory_space<vmem>>, vector<1x1x8x128xf32>
      %37 = vector.shape_cast %36 : vector<1x1x8x128xf32> to vector<8x128xf32>
      %38 = vector.shape_cast %35 : vector<8x128xf32> to vector<1x8x128xf32>
      %cst_14 = arith.constant dense<0.000000e+00> : vector<8x128xf32>
      %39 = vector.multi_reduction <add>, %38, %cst_14 [0] : vector<1x8x128xf32> to vector<8x128xf32>
      %40 = arith.addf %37, %39 : vector<8x128xf32>
      %c0_15 = arith.constant 0 : index
      %c0_16 = arith.constant 0 : index
      %c0_17 = arith.constant 0 : index
      %c0_18 = arith.constant 0 : index
      %41 = vector.load %arg5[%c0_15, %c0_16, %c0_17, %c0_18] : memref<1x1x8x128xf32, #tpu.memory_space<vmem>>, vector<1x1x8x128xf32>
      %42 = vector.shape_cast %41 : vector<1x1x8x128xf32> to vector<8x128xf32>
      %43 = vector.shape_cast %40 : vector<8x128xf32> to vector<1x1x8x128xf32>
      tpu.vector_store %arg5[%c0_15, %c0_16, %c0_17, %c0_18], %43 {strides = array<i32>} : memref<1x1x8x128xf32, #tpu.memory_space<vmem>>, vector<1x1x8x128xf32>,
    } else {
    }
    %true = arith.constant true
    %10 = arith.xori %7, %true : i1
    %11 = arith.extui %10 : i1 to i32
    %c0_i32_4 = arith.constant 0 : i32
    %12 = arith.cmpi ne, %11, %c0_i32_4 : i32
    scf.if %12 {
      %c0 = arith.constant 0 : index
      %c0_5 = arith.constant 0 : index
      %13 = vector.load %arg3[%c0, %c0_5] : memref<8x128xf32, #tpu.memory_space<vmem>>, vector<8x128xf32>
      %c0_6 = arith.constant 0 : index
      %c0_7 = arith.constant 0 : index
      %14 = vector.load %arg4[%c0_6, %c0_7] : memref<8x1xf32, #tpu.memory_space<vmem>>, vector<8x1xf32>
      %15 = vector.broadcast %14 : vector<8x1xf32> to vector<8x128xf32>
      %16 = arith.subf %13, %15 : vector<8x128xf32>
      %17 = arith.mulf %16, %16 : vector<8x128xf32>
      %cst = arith.constant 2.500000e-01 : f32
      %18 = vector.broadcast %cst : f32 to vector<8x128xf32>
      %19 = arith.cmpf ogt, %17, %18 : vector<8x128xf32>
      %cst_8 = arith.constant 0.000000e+00 : f32
      %20 = vector.broadcast %cst_8 : f32 to vector<8x128xf32>
      %21 = arith.select %19, %17, %20 : vector<8x128xi1>, vector<8x128xf32>
      %c0_9 = arith.constant 0 : index
      %c0_10 = arith.constant 0 : index
      %c0_11 = arith.constant 0 : index
      %c0_12 = arith.constant 0 : index
      %22 = vector.load %arg5[%c0_9, %c0_10, %c0_11, %c0_12] : memref<1x1x8x128xf32, #tpu.memory_space<vmem>>, vector<1x1x8x128xf32>
      %23 = vector.shape_cast %22 : vector<1x1x8x128xf32> to vector<8x128xf32>
      %24 = vector.shape_cast %21 : vector<8x128xf32> to vector<1x8x128xf32>
      %cst_13 = arith.constant dense<0.000000e+00> : vector<8x128xf32>
      %25 = vector.multi_reduction <add>, %24, %cst_13 [0] : vector<1x8x128xf32> to vector<8x128xf32>
      %26 = arith.addf %23, %25 : vector<8x128xf32>
      %c0_14 = arith.constant 0 : index
      %c0_15 = arith.constant 0 : index
      %c0_16 = arith.constant 0 : index
      %c0_17 = arith.constant 0 : index
      %27 = vector.load %arg5[%c0_14, %c0_15, %c0_16, %c0_17] : memref<1x1x8x128xf32, #tpu.memory_space<vmem>>, vector<1x1x8x128xf32>
      %28 = vector.shape_cast %27 : vector<1x1x8x128xf32> to vector<8x128xf32>
      %29 = vector.shape_cast %26 : vector<8x128xf32> to vector<1x1x8x128xf32>
      tpu.vector_store %arg5[%c0_14, %c0_15, %c0_16, %c0_17], %29 {strides = array<i32>} : memref<1x1x8x128xf32, #tpu.memory_space<vmem>>, vector<1x1x8x128xf32>,
    } else {
    }
    return
  }
  func.func @transform_0(%arg0: i32, %arg1: i32, %arg2: i32) -> (i32, i32) {
    %c1_i32 = arith.constant 1 : i32
    %0 = arith.muli %arg0, %c1_i32 : i32
    %1 = arith.addi %0, %arg2 : i32
    %c0_i32 = arith.constant 0 : i32
    %2 = arith.minsi %1, %c0_i32 : i32
    %c0_i32_0 = arith.constant 0 : i32
    return %arg1, %2 : i32, i32
  }
  func.func @transform_1(%arg0: i32, %arg1: i32, %arg2: i32) -> (i32, i32) {
    %c0_i32 = arith.constant 0 : i32
    %c0_i32_0 = arith.constant 0 : i32
    return %arg1, %c0_i32 : i32, i32
  }
  func.func @transform_2(%arg0: i32, %arg1: i32, %arg2: i32) -> (i32, i32, i32, i32) {
    %c0_i32 = arith.constant 0 : i32
    %c0_i32_0 = arith.constant 0 : i32
    %c0_i32_1 = arith.constant 0 : i32
    return %arg0, %arg1, %c0_i32, %c0_i32_0 : i32, i32, i32, i32
  }
}

</mosaic_0001>

<bundles_post_ra>
// kernel: tpu_custom_call.1
= control target key start
LH: loop header
LB: loop body
LE: loop exit
PB: predicated region body
PF: predicated region fallthrough
CT: control target
= control target key end

     0   :  { %s181_s0 = inlined_call_operand.vmem [shape: f32[2,8], index: 0, kind: input, shape index: {}]   ;;  %s182_s1 = inlined_call_operand.vmem [shape: f32[2,1], index: 1, kind: input, shape index: {}]   ;;  %s183_s2 = inlined_call_operand.hbm [shape: f32[1,1,8,128], index: 2, kind: output, shape index: {}]  }
   0x1   :  { %v52_v0 = vld [vmem:[%s182_s1] sm:$0xff] }
   0x2   :  { %7 = vsyncpa [#allocation3], 0  ;;  %v146_v1 = vmov 0   ;;  %v62_v2 = vlaneseq  ;;  %v51_v3 = vld [vmem:[%s181_s0] sm:$0xff]  ;;  %s147_s13 = smov [#allocation2]  }
   0x3   :  { %121 = vset.pattern.permute.xlu0 %v146_v1  ;;  %s104_s1 = sshll.u32 %s147_s13, 4  ;;  %s105_s1 = int_to_ptr.vmem [resolvable:$true] %s104_s1 }
   0x4   :  { %55 = vperm.xlu0 %121, %v52_v0   ;;  %v63_v4 = vshrl.u32 %v62_v2, 7  ;;  %v70_v5 = vand.u32 127, %v62_v2  ;;  %s122_s14 = scalar_lea.vmem %s105_s1, 128  ;;  %p127_p1 = scmp.lt.s32.totalorder %s105_s1, %s105_s1 }
   0x5   :  { %p123_p0 = scmp.ne.s32.totalorder %s105_s1, %s122_s14  ;;  %p128_p2 = scmp.lt.s32.totalorder %s122_s14, %s122_s14 }
   0x6   :  { %vm66_vm0 = vcmp.lt.s32.totalorder %v63_v4, 2  ;;  %vm73_vm1 = vcmp.lt.s32.totalorder %v70_v5, 8 }
   0x7   :  { %p129_p3 = por %p128_p2, %p127_p1 }
   0x9   :  { %p130_p4 = pnand %p129_p3, %p123_p0 }
  0x83   :  { %v56_v6 = vpop.permute.xlu0 %55 }
  0x84   :  { %v58_v7 = vsub.f32 %v51_v3, %v56_v6 }
  0x86   :  { %v59_v8 = vmul.f32 %v58_v7, %v58_v7 }
  0x88   :  { %vm60_vm2 = vcmp.gt.f32.partialorder %v59_v8, 0.25 }
  0x89   :  { %vm67_vm3 = vmand %vm60_vm2, %vm66_vm0 }
  0x8a   :  { %vm74_vm4 = vmand %vm67_vm3, %vm73_vm1 }
  0x8b   :  { %v75_v9 = vsel %vm74_vm4, %v59_v8, 0.0 }
  0x8c   :  { %79 = vst [vmem:[#allocation2] sm:$0xff] %v75_v9 }
  0x8d   :  { %133 = shalt.err (!%p130_p4)
}
  0x8e   :  { %s134_s16 = scalar_lea.hbm %s183_s2, 128 }
  0x8f   :  { %p135_p5 = scmp.ne.s32.totalorder %s183_s2, %s134_s16  ;;  %p138_p6 = scmp.lt.u32.totalorder %s134_s16, %s183_s2 }
  0x91   :  { %p140_p7 = pnand %p138_p6, %p135_p5 }
  0x93   :  { %143 = shalt.err (!%p140_p7)
}
  0x94   :  { %107 = dma.vmem_to_hbm [thread:$0]  %s105_s1, 128, %s183_s2, [#allocation3]  }
  0x95   :  { %144 = dma.done.wait [#allocation3], 128  }
  0x96   :  { %145 = vsyncadd [#allocation3], 4294967168 }
  0x97   :  { %111 = vsyncpa [#allocation3], 1 }

</bundles_post_ra>
